<compile_context>
chip_gen: v6e
topology: v6e:2x2x1
jax: 0.10.0
libtpu: 0.0.40
codegen_flags: <defaults>
</compile_context>

<pallas_src>
import jax
import jax.numpy as jnp
from jax.experimental import pallas as pl
from jax.experimental.pallas import tpu as pltpu


def _r2c_copy_kernel(real_in_ref, imag_in_ref, real_out_ref, imag_out_ref):
    # Pure lane-dense tile copies: (tm, Np) per plane per grid step.
    real_out_ref[...] = real_in_ref[...]
    imag_out_ref[...] = imag_in_ref[...]


def _round_up(a: int, b: int) -> int:
    return ((a + b - 1) // b) * b


def real_to_complex_batch(x: jax.Array) -> jax.Array:
    """JAX/Pallas equivalent of RealToComplexBatch.forward."""
    assert x.ndim == 6, "expected a 6-D input"
    d0, d1, d2, k, d4, d5 = x.shape
    assert k >= 2, "axis 3 must have at least 2 entries (real, imag)"

    M = d0 * d1 * d2
    N = d4 * d5
    itemsize = jnp.dtype(x.dtype).itemsize

    # Lane-pad N to a multiple of 128 so every block is unmasked & lane-aligned.
    Np = _round_up(N, 128)
    if Np == N:
        x_flat = x.reshape(M, k * N)               # metadata-only reshape
    else:
        x3 = jnp.pad(x.reshape(M, k, N), ((0, 0), (0, 0), (0, Np - N)))
        x_flat = x3.reshape(M, k * Np)

    # Row tile: largest multiple of 8 that fits a conservative VMEM budget
    # (2 input + 2 output blocks, each double-buffered) -> safe on v5e/v6e/v7x.
    vmem_block_budget = 16 * 1024 * 1024
    bytes_per_row = 4 * 2 * Np * itemsize          # 4 blocks x 2 buffers
    if M < 8:
        tm = M                                     # block == full dim is legal
    else:
        tm = max(8, (vmem_block_budget // bytes_per_row) // 8 * 8)
        tm = min(tm, (M // 8) * 8)                 # multiple of 8, <= M
    grid = (pl.cdiv(M, tm),)

    real, imag = pl.pallas_call(
        _r2c_copy_kernel,
        out_shape=(
            jax.ShapeDtypeStruct((M, Np), x.dtype),
            jax.ShapeDtypeStruct((M, Np), x.dtype),
        ),
        grid_spec=pltpu.PrefetchScalarGridSpec(
            num_scalar_prefetch=0,
            grid=grid,
            in_specs=[
                pl.BlockSpec((tm, Np), lambda i: (i, 0)),  # real plane columns
                pl.BlockSpec((tm, Np), lambda i: (i, 1)),  # imag plane columns
            ],
            out_specs=[
                pl.BlockSpec((tm, Np), lambda i: (i, 0)),
                pl.BlockSpec((tm, Np), lambda i: (i, 0)),
            ],
        ),
        compiler_params=pltpu.CompilerParams(
            dimension_semantics=("parallel",),
            vmem_limit_bytes=48 * 1024 * 1024,
        ),
        cost_estimate=pl.CostEstimate(
            flops=0,
            transcendentals=0,
            bytes_accessed=4 * M * Np * itemsize,
        ),
    )(x_flat, x_flat)   # same array, two lane-dense views via index_maps

    if Np != N:
        real = real[:, :N]
        imag = imag[:, :N]
    real = real.reshape(d0, d1, d2, d4, d5)
    imag = imag.reshape(d0, d1, d2, d4, d5)

    # lax.complex only accepts f32/f64; upcast narrower float inputs.
    if not (real.dtype == jnp.float32 or real.dtype == jnp.float64):
        real = real.astype(jnp.float32)
        imag = imag.astype(jnp.float32)
    # TODO(synk): the final real/imag -> complex64 interleave stays in plain JAX
    # (Pallas TPU has no complex VMEM dtype and XLA bitcast_convert does not
    # support complex), costing one extra fused HBM pass over the output.
    return jax.lax.complex(real, imag)


if __name__ == "__main__":
    key = jax.random.PRNGKey(0)
    # Small 6-D shape consistent with the module: (B, C, D, 2, H, W); H*W = 128.
    x = jax.random.normal(key, (2, 3, 4, 2, 8, 16), dtype=jnp.float32)

    fn = jax.jit(real_to_complex_batch)
    out = jax.block_until_ready(fn(x))

    # Reference check in plain JAX.
    ref = jax.lax.complex(x[:, :, :, 0], x[:, :, :, 1])
    assert out.shape == ref.shape == (2, 3, 4, 8, 16)
    assert out.dtype == jnp.complex64
    assert jnp.allclose(out, ref)

    print("KERNEL_OK")
</pallas_src>

<mosaic_0001>
module attributes {stable_mosaic.version = 11 : i64} {
  func.func @_r2c_copy_kernel(%arg0: i32, %arg1: memref<24x128xf32, #tpu.memory_space<vmem>>, %arg2: memref<24x128xf32, #tpu.memory_space<vmem>>, %arg3: memref<24x128xf32, #tpu.memory_space<vmem>>, %arg4: memref<24x128xf32, #tpu.memory_space<vmem>>) attributes {dimension_semantics = [#tpu.dimension_semantics<parallel>], iteration_bounds = array<i64: 1>, scalar_prefetch = 0 : i64, scratch_operands = 0 : i64, tpu.core_type = #tpu.core_type<tc>, window_params = [{transform_indices = @transform_0, window_bounds = array<i64: 24, 128>}, {transform_indices = @transform_1, window_bounds = array<i64: 24, 128>}, {transform_indices = @transform_2, window_bounds = array<i64: 24, 128>}, {transform_indices = @transform_3, window_bounds = array<i64: 24, 128>}]} {
    %c0 = arith.constant 0 : index
    %c0_0 = arith.constant 0 : index
    %0 = vector.load %arg1[%c0, %c0_0] : memref<24x128xf32, #tpu.memory_space<vmem>>, vector<24x128xf32>
    %c0_1 = arith.constant 0 : index
    %c0_2 = arith.constant 0 : index
    %1 = vector.load %arg3[%c0_1, %c0_2] : memref<24x128xf32, #tpu.memory_space<vmem>>, vector<24x128xf32>
    tpu.vector_store %arg3[%c0_1, %c0_2], %0 {strides = array<i32>} : memref<24x128xf32, #tpu.memory_space<vmem>>, vector<24x128xf32>,
    %c0_3 = arith.constant 0 : index
    %c0_4 = arith.constant 0 : index
    %2 = vector.load %arg2[%c0_3, %c0_4] : memref<24x128xf32, #tpu.memory_space<vmem>>, vector<24x128xf32>
    %c0_5 = arith.constant 0 : index
    %c0_6 = arith.constant 0 : index
    %3 = vector.load %arg4[%c0_5, %c0_6] : memref<24x128xf32, #tpu.memory_space<vmem>>, vector<24x128xf32>
    tpu.vector_store %arg4[%c0_5, %c0_6], %2 {strides = array<i32>} : memref<24x128xf32, #tpu.memory_space<vmem>>, vector<24x128xf32>,
    return
  }
  func.func @transform_0(%arg0: i32) -> (i32, i32) {
    %c0_i32 = arith.constant 0 : i32
    %c0_i32_0 = arith.constant 0 : i32
    return %arg0, %c0_i32 : i32, i32
  }
  func.func @transform_1(%arg0: i32) -> (i32, i32) {
    %c1_i32 = arith.constant 1 : i32
    %c0_i32 = arith.constant 0 : i32
    return %arg0, %c1_i32 : i32, i32
  }
  func.func @transform_2(%arg0: i32) -> (i32, i32) {
    %c0_i32 = arith.constant 0 : i32
    %c0_i32_0 = arith.constant 0 : i32
    return %arg0, %c0_i32 : i32, i32
  }
  func.func @transform_3(%arg0: i32) -> (i32, i32) {
    %c0_i32 = arith.constant 0 : i32
    %c0_i32_0 = arith.constant 0 : i32
    return %arg0, %c0_i32 : i32, i32
  }
}

</mosaic_0001>

<bundles_post_ra>
// kernel: custom-call
= control target key start
LH: loop header
LB: loop body
LE: loop exit
PB: predicated region body
PF: predicated region fallthrough
CT: control target
= control target key end

     0   :  { %s92_s0 = inlined_call_operand.vmem [shape: f32[2,3,4,8,16], index: 0, kind: input, shape index: {}]   ;;  %s93_s1 = inlined_call_operand.vmem [shape: f32[2,3,4,8,16], index: 1, kind: input, shape index: {}]   ;;  %s94_s2 = inlined_call_operand.hbm [shape: c64[2,3,4,8,16], index: 2, kind: output, shape index: {}]  }
   0x1   :  { %s3_s11 = scalar_lea.hbm %s94_s2, 3072 }
   0x2   :  { %4 = vsyncpa [#allocation0], 0  ;;  %s5_s14 = sshll.u32 %s92_s0, 4  ;;  %s6_s14 = int_to_ptr.vmem [resolvable:$true] %s5_s14 }
   0x3   :  { %s18_s15 = scalar_lea.vmem %s6_s14, 3072  ;;  %p23_p1 = scmp.lt.s32.totalorder %s6_s14, %s6_s14 }
   0x4   :  { %p19_p0 = scmp.ne.s32.totalorder %s6_s14, %s18_s15  ;;  %p24_p2 = scmp.lt.s32.totalorder %s18_s15, %s18_s15 }
   0x6   :  { %p25_p3 = por %p24_p2, %p23_p1 }
   0x8   :  { %p26_p4 = pnand %p25_p3, %p19_p0 }
   0xa   :  { %29 = shalt.err (!%p26_p4)  }
   0xb   :  { %8 = dma.vmem_to_hbm [thread:$0]  %s6_s14, 3072, %s94_s2, [#allocation0] }
   0xc   :  { %61 = dma.done.wait [#allocation0], 3072  }
   0xd   :  { %62 = vsyncadd [#allocation0], 4294964224 }
   0xe   :  { %10 = vsyncpa [#allocation0], 1 }
   0xf   :  { %11 = vsyncpa [#allocation1], 0  ;;  %s12_s0 = sshll.u32 %s93_s1, 4  ;;  %s13_s0 = int_to_ptr.vmem [resolvable:$true] %s12_s0 }
  0x10   :  { %s38_s20 = scalar_lea.vmem %s13_s0, 3072  ;;  %p43_p6 = scmp.lt.s32.totalorder %s13_s0, %s13_s0 }
  0x11   :  { %p39_p5 = scmp.ne.s32.totalorder %s13_s0, %s38_s20  ;;  %p44_p7 = scmp.lt.s32.totalorder %s38_s20, %s38_s20 }
  0x13   :  { %p45_p8 = por %p44_p7, %p43_p6 }
  0x15   :  { %p46_p9 = pnand %p45_p8, %p39_p5 }
  0x17   :  { %49 = shalt.err (!%p46_p9)  }
  0x18   :  { %15 = dma.vmem_to_hbm [thread:$0]  %s13_s0, 3072, %s3_s11, [#allocation1] }
  0x19   :  { %63 = dma.done.wait [#allocation1], 3072  }
  0x1a   :  { %64 = vsyncadd [#allocation1], 4294964224 }
  0x1b   :  { %17 = vsyncpa [#allocation1], 1 }

</bundles_post_ra>
